<compile_context>
chip_gen: v6e
topology: v6e:2x2x1
jax: 0.10.0
libtpu: 0.0.40
codegen_flags: <defaults>
</compile_context>

<pallas_src>
import math

import jax
import jax.numpy as jnp
from jax.experimental import pallas as pl
from jax.experimental.pallas import tpu as pltpu


# ----------------------------- helpers ------------------------------------- #

def _round_up(a: int, b: int) -> int:
    return (a + b - 1) // b * b


def _lcm(a: int, b: int) -> int:
    return a * b // math.gcd(a, b)


def _vmem_limit_bytes() -> int:
    """~75% of this generation's VMEM (leave headroom for Mosaic scratch)."""
    try:
        cap = int(pltpu.get_tpu_info().vmem_capacity_bytes)
        return max(32 << 20, (cap * 3) // 4)
    except Exception:
        return 48 << 20          # safe on v5e/v6e/v7x


def _interp_matrix(in_size: int, out_size: int) -> jnp.ndarray:
    """1-D linear interpolation matrix M (out_size, in_size), align_corners=True."""
    if out_size == 1:
        return jnp.zeros((1, in_size), jnp.float32).at[0, 0].set(1.0)
    src = jnp.arange(out_size, dtype=jnp.float32) * (in_size - 1) / (out_size - 1)
    i0 = jnp.clip(jnp.floor(src).astype(jnp.int32), 0, in_size - 1)
    i1 = jnp.clip(i0 + 1, 0, in_size - 1)
    w1 = src - i0.astype(jnp.float32)
    w0 = 1.0 - w1
    rows = jnp.arange(out_size)
    M = jnp.zeros((out_size, in_size), jnp.float32)
    M = M.at[rows, i0].add(w0)
    M = M.at[rows, i1].add(w1)
    return M


# ----------------------------- kernels -------------------------------------- #

def _kron_interp_kernel(kT_ref, x_ref, o_ref):
    # kT_ref : (Hin*Win, Hout*Wout) f32   grid-invariant fused operator
    # x_ref  : (B, Hin*Win)               block of flattened planes
    # o_ref  : (B, Hout*Wout)             lane-dense output block
    o_ref[...] = jnp.dot(
        x_ref[...], kT_ref[...], preferred_element_type=jnp.float32
    ).astype(o_ref.dtype)


def _separable_interp_kernel(ry_ref, kblk_ref, xT_ref, o_ref):
    # ry_ref   : (Hout, Hin) f32                 grid-invariant
    # kblk_ref : (blk*Win, blk*Wout) f32         block-diag kron(I_blk, Rx^T), invariant
    # xT_ref   : (Hin, blk*Win)                  lane-dense plane block
    # o_ref    : (Hout, blk*Wout)                lane-dense output block
    # Two wide 2-D GEMMs, no in-kernel reshape / transpose / broadcast.
    t = jnp.dot(ry_ref[...], xT_ref[...], preferred_element_type=jnp.float32)
    out = jnp.dot(t, kblk_ref[...], preferred_element_type=jnp.float32)
    o_ref[...] = out.astype(o_ref.dtype)


# ----------------------------- wrapper -------------------------------------- #

_MAX_PLANES_PER_BLOCK = 2048     # kron path M-dim sanity cap (multiple of all aligns)
_SEP_MAX_PLANES = 64             # bounds the blk-redundant FLOPs of the kron(I,RxT) GEMM


def _choose_kron_block(nc: int, per_plane_bytes: int, budget: int, align: int) -> int:
    """Planes per grid step for the kron path.  Single step when everything fits."""
    blk = (budget // max(1, per_plane_bytes)) // align * align
    blk = max(align, min(blk, _MAX_PLANES_PER_BLOCK))
    if blk >= nc:
        return nc                # one grid step; full-extent block, no padding needed
    return blk


def _choose_separable_block(nc: int, w_in: int, w_out: int,
                            per_plane_bytes: int, budget: int, align: int) -> int:
    """Planes per grid step for the separable path (accounts for the blk^2 weight)."""
    def vmem_cost(b):
        # double-buffered plane in/out blocks + double-buffered block-diag weight
        return b * per_plane_bytes + 2 * (b * w_in) * (b * w_out) * 4
    if nc <= _SEP_MAX_PLANES and vmem_cost(nc) <= budget:
        return nc                # one grid step; full-extent blocks
    blk = align
    while blk * 2 <= min(_SEP_MAX_PLANES, nc) and vmem_cost(blk * 2) <= budget:
        blk *= 2
    return blk


def interpolate_bilinear_align_corners(x, size, path=None):
    """Equivalent of F.interpolate(x, size, mode='bilinear', align_corners=True).

    x: (N, C, H_in, W_in) array (NCHW).  size: int or (H_out, W_out).
    path: None (auto), "kron" (fused single-GEMM) or "separable" (two wide GEMMs).
    """
    if isinstance(size, int):
        size = (size, size)
    N, C, H_in, W_in = x.shape
    H_out, W_out = size
    NC = N * C
    itemsize = x.dtype.itemsize

    # Interpolation weights stay f32 (mixed-precision dot if x is bf16).
    ry = _interp_matrix(H_in, H_out)           # (H_out, H_in) f32
    rx = _interp_matrix(W_in, W_out)           # (W_out, W_in) f32

    vmem_limit = _vmem_limit_bytes()
    compiler_params = pltpu.CompilerParams(
        dimension_semantics=("parallel",),
        vmem_limit_bytes=vmem_limit,
    )

    kron_bytes = H_in * W_in * H_out * W_out * 4
    kron_gate = min(16 << 20, vmem_limit // 6)           # ~8 MiB on v7x, ~16 MiB on v5e/v6e
    if path is None:
        path = "kron" if kron_bytes <= kron_gate else "separable"

    io_bytes = NC * (H_in * W_in + H_out * W_out) * itemsize

    if path == "kron":
        # Fused separable operator: out_flat = x_flat @ kron(Ry, Rx)^T (one GEMM).
        kT = jnp.einsum("oh,pw->hwop", ry, rx).reshape(H_in * W_in, H_out * W_out)

        # The invariant kT is still double-buffered by the pipeline -> charge 2x.
        budget = max(2 << 20, vmem_limit // 2 - 2 * kron_bytes)
        per_plane = (H_in * W_in + H_out * W_out) * itemsize * 2   # double-buffered in+out
        align = max(8, 32 // itemsize)                             # f32 -> 8 rows, bf16 -> 16
        blk = _choose_kron_block(NC, per_plane, budget, align)
        nc_pad = NC if blk == NC else _round_up(NC, blk)

        planes = x.reshape(NC, H_in * W_in)
        if nc_pad != NC:
            planes = jnp.pad(planes, ((0, nc_pad - NC), (0, 0)))

        cost = pl.CostEstimate(
            flops=2 * NC * H_in * W_in * H_out * W_out,
            transcendentals=0,
            bytes_accessed=io_bytes + kron_bytes,
        )
        out = pl.pallas_call(
            _kron_interp_kernel,
            out_shape=jax.ShapeDtypeStruct((nc_pad, H_out * W_out), x.dtype),
            grid_spec=pltpu.PrefetchScalarGridSpec(
                num_scalar_prefetch=0,
                grid=(nc_pad // blk,),
                in_specs=[
                    pl.BlockSpec((H_in * W_in, H_out * W_out), lambda i: (0, 0)),
                    pl.BlockSpec((blk, H_in * W_in), lambda i: (i, 0)),
                ],
                out_specs=pl.BlockSpec((blk, H_out * W_out), lambda i: (i, 0)),
            ),
            compiler_params=compiler_params,
            cost_estimate=cost,
        )(kT, planes)
        return out[:NC].reshape(N, C, H_out, W_out)

    # ---------------- general separable path (two wide 2-D GEMMs) --------------- #
    rxT = rx.T                                              # (W_in, W_out) f32
    mat_bytes = (H_out * H_in) * 4
    budget = max(2 << 20, vmem_limit // 2 - 2 * mat_bytes)
    per_plane = ((H_in * W_in + H_out * W_out) * itemsize * 2      # double-buffered in+out
                 + H_out * W_in * 4)                               # f32 intermediate t
    # Multi-step blocks must keep lane dims multiples of 128 (single step is exempt).
    align = _lcm(128 // math.gcd(W_in, 128), 128 // math.gcd(W_out, 128))
    blk = _choose_separable_block(NC, W_in, W_out, per_plane, budget, align)
    nc_pad = NC if blk == NC else _round_up(NC, blk)

    planes = x.reshape(NC, H_in, W_in)
    if nc_pad != NC:
        planes = jnp.pad(planes, ((0, nc_pad - NC), (0, 0), (0, 0)))
    # Wrapper-side layout plumbing: planes -> (H_in, NC*W_in) lane-dense slab.
    xT = jnp.transpose(planes, (1, 0, 2)).reshape(H_in, nc_pad * W_in)
    # Block-diagonal W-contraction operator for one plane block (grid-invariant).
    kblk = jnp.kron(jnp.eye(blk, dtype=jnp.float32), rxT)  # (blk*W_in, blk*W_out)

    cost = pl.CostEstimate(
        flops=2 * NC * H_out * H_in * W_in + 2 * NC * H_out * W_in * W_out * blk,
        transcendentals=0,
        bytes_accessed=io_bytes + mat_bytes + kblk.size * 4,
    )
    out = pl.pallas_call(
        _separable_interp_kernel,
        out_shape=jax.ShapeDtypeStruct((H_out, nc_pad * W_out), x.dtype),
        grid_spec=pltpu.PrefetchScalarGridSpec(
            num_scalar_prefetch=0,
            grid=(nc_pad // blk,),
            in_specs=[
                pl.BlockSpec((H_out, H_in), lambda i: (0, 0)),
                pl.BlockSpec((blk * W_in, blk * W_out), lambda i: (0, 0)),
                pl.BlockSpec((H_in, blk * W_in), lambda i: (0, i)),
            ],
            out_specs=pl.BlockSpec((H_out, blk * W_out), lambda i: (0, i)),
        ),
        compiler_params=compiler_params,
        cost_estimate=cost,
    )(ry, kblk, xT)
    # (H_out, nc_pad*W_out) -> (NC, H_out, W_out) -> NCHW (wrapper-side plumbing).
    out = out.reshape(H_out, nc_pad, W_out).transpose(1, 0, 2)[:NC]
    return out.reshape(N, C, H_out, W_out)


# --------------------------- MaskLoss pieces --------------------------------- #

def gs_to_bd(gs):
    """Boundary points of a (B, 2, H, W) grid -> (B, 2*W + 2*(H-2), 2)."""
    t = jnp.concatenate(
        [gs[..., 0, :], gs[..., -1, :], gs[..., 1:-1, 0], gs[..., 1:-1, -1]], axis=2)
    return jnp.transpose(t, (0, 2, 1))


class MaskLoss:
    """Partial JAX/Pallas port of PaperEdge's MaskLoss.

    The bilinear F.interpolate(align_corners=True) of the warp grid runs as a
    Pallas TPU kernel; gs_to_bd / target-grid construction are plain-JAX glue.
    The constant target grid is cached per output size (input independent).
    """

    def __init__(self, gsize):
        self.gsize = gsize
        self.msk = jnp.ones((1, 1, gsize, gsize), jnp.float32)
        self.cn = jnp.asarray([[-1, -1], [1, -1], [1, 1], [-1, 1]], jnp.float32)[None]
        self._dst_cache = {}

    def _target_boundary(self, s):
        if s not in self._dst_cache:
            lin = jnp.linspace(-1.0, 1.0, s)
            iy, ix = jnp.meshgrid(lin, lin, indexing="ij")
            t = jnp.stack((ix, iy), axis=0)[None]           # (1, 2, s, s)
            self._dst_cache[s] = gs_to_bd(t)                 # (1, n_bd, 2)
        return self._dst_cache[s]

    def __call__(self, gs, s):
        tgs = interpolate_bilinear_align_corners(gs, (s, s))   # Pallas kernel
        srcpts = gs_to_bd(tgs)
        d = self._target_boundary(s)
        dstpts = jnp.broadcast_to(d, (gs.shape[0],) + d.shape[1:])
        # TODO(synk): TpsWarp/PspWarp, F.grid_sample and the two L1 losses of the
        # original MaskLoss.forward are not defined in the provided spec, so the
        # scalar loss itself cannot be faithfully computed here.
        return tgs, srcpts, dstpts


# ------------------------------- main ---------------------------------------- #

if __name__ == "__main__":
    key = jax.random.PRNGKey(0)
    # Shapes implied by MaskLoss.forward: gs is a (B, 2, gsize, gsize) warp grid
    # that gets bilinearly upsampled to (s, s).
    B, C, gsize, s = 2, 2, 16, 32
    gs = jax.random.normal(key, (B, C, gsize, gsize), dtype=jnp.float32)

    # Pure-JAX reference for the interpolation (same exact formulation).
    ry = _interp_matrix(gsize, s)
    rx = _interp_matrix(gsize, s)
    ref = jnp.einsum("oh,nchw,pw->ncop", ry, gs, rx)

    # Fused Kronecker path (lane-dense single GEMM, single grid step here).
    y_kron = jax.block_until_ready(
        interpolate_bilinear_align_corners(gs, (s, s), path="kron"))
    assert y_kron.shape == (B, C, s, s)
    assert float(jnp.max(jnp.abs(y_kron - ref))) < 1e-4

    # General separable path (two wide lane-dense GEMMs).
    y_sep = jax.block_until_ready(
        interpolate_bilinear_align_corners(gs, (s, s), path="separable"))
    assert y_sep.shape == (B, C, s, s)
    assert float(jnp.max(jnp.abs(y_sep - ref))) < 1e-4

    # MaskLoss forward glue (Pallas interpolate + boundary extraction).
    ml = MaskLoss(gsize)
    tgs, srcpts, dstpts = ml(gs, s)
    tgs = jax.block_until_ready(tgs)
    n_bd = 2 * s + 2 * (s - 2)
    assert tgs.shape == (B, C, s, s)
    assert srcpts.shape == (B, n_bd, 2)
    assert dstpts.shape == (B, n_bd, 2)
    assert float(jnp.max(jnp.abs(tgs - ref))) < 1e-4

    print("KERNEL_OK")
</pallas_src>

<mosaic_0001>
module attributes {stable_mosaic.version = 11 : i64} {
  func.func @_kron_interp_kernel(%arg0: i32, %arg1: memref<256x1024xf32, #tpu.memory_space<vmem>>, %arg2: memref<4x256xf32, #tpu.memory_space<vmem>>, %arg3: memref<4x1024xf32, #tpu.memory_space<vmem>>) attributes {dimension_semantics = [#tpu.dimension_semantics<parallel>], iteration_bounds = array<i64: 1>, scalar_prefetch = 0 : i64, scratch_operands = 0 : i64, tpu.core_type = #tpu.core_type<tc>, window_params = [{pipeline_mode = #tpu.pipeline_mode<synchronous>, transform_indices = @transform_0, window_bounds = array<i64: 256, 1024>}, {transform_indices = @transform_1, window_bounds = array<i64: 4, 256>}, {transform_indices = @transform_2, window_bounds = array<i64: 4, 1024>}]} {
    %c0 = arith.constant 0 : index
    %c0_0 = arith.constant 0 : index
    %0 = vector.load %arg2[%c0, %c0_0] : memref<4x256xf32, #tpu.memory_space<vmem>>, vector<4x256xf32>
    %c0_1 = arith.constant 0 : index
    %c0_2 = arith.constant 0 : index
    %1 = vector.load %arg1[%c0_1, %c0_2] : memref<256x1024xf32, #tpu.memory_space<vmem>>, vector<256x1024xf32>
    %cst = arith.constant dense<0.000000e+00> : vector<4x1024xf32>
    %2 = tpu.matmul %0, %1, %cst {dimension_numbers = #tpu.dot_dimension_numbers<[1], [0], [0], [1], [0, 0, 1, 1], [], []>} : vector<4x256xf32>, vector<256x1024xf32>, vector<4x1024xf32> -> vector<4x1024xf32>
    %c0_3 = arith.constant 0 : index
    %c0_4 = arith.constant 0 : index
    %3 = vector.load %arg3[%c0_3, %c0_4] : memref<4x1024xf32, #tpu.memory_space<vmem>>, vector<4x1024xf32>
    tpu.vector_store %arg3[%c0_3, %c0_4], %2 {strides = array<i32>} : memref<4x1024xf32, #tpu.memory_space<vmem>>, vector<4x1024xf32>,
    return
  }
  func.func @transform_0(%arg0: i32) -> (i32, i32) {
    %c0_i32 = arith.constant 0 : i32
    %c0_i32_0 = arith.constant 0 : i32
    %c0_i32_1 = arith.constant 0 : i32
    return %c0_i32, %c0_i32_0 : i32, i32
  }
  func.func @transform_1(%arg0: i32) -> (i32, i32) {
    %c0_i32 = arith.constant 0 : i32
    %c0_i32_0 = arith.constant 0 : i32
    return %arg0, %c0_i32 : i32, i32
  }
  func.func @transform_2(%arg0: i32) -> (i32, i32) {
    %c0_i32 = arith.constant 0 : i32
    %c0_i32_0 = arith.constant 0 : i32
    return %arg0, %c0_i32 : i32, i32
  }
}

</mosaic_0001>

<bundles_post_ra>
// kernel: tpu_custom_call.1
= control target key start
LH: loop header
LB: loop body
LE: loop exit
PB: predicated region body
PF: predicated region fallthrough
CT: control target
= control target key end

     0   :  { %7 = vsyncpa [#allocation3], 0  ;;  %s733_s0 = inlined_call_operand.hbm [shape: f32[256,1024], index: 0, kind: input, shape index: {}]   ;;  %s734_s1 = inlined_call_operand.hbm [shape: f32[4,256], index: 1, kind: input, shape index: {}]   ;;  %s735_s2 = inlined_call_operand.hbm [shape: f32[4,1024], index: 2, kind: output, shape index: {}]  }
   0x1   :  { %8 = vsyncpa [#allocation6], 0 }
   0x2   :  { %9 = vsyncpa [#allocation4], 0  ;;  %s690_s9 = smov [#allocation2]  }
   0x3   :  { %s15_s10 = sshll.u32 %s690_s9, 4  ;;  %s16_s10 = int_to_ptr.vmem [resolvable:$true] %s15_s10 }
   0x4   :  { %s632_s11 = scalar_lea.vmem %s16_s10, 32768  ;;  %p637_p1 = scmp.lt.s32.totalorder %s16_s10, %s16_s10 }
   0x5   :  { %p633_p0 = scmp.ne.s32.totalorder %s16_s10, %s632_s11  ;;  %p638_p2 = scmp.lt.s32.totalorder %s632_s11, %s632_s11 }
   0x7   :  { %p639_p3 = por %p638_p2, %p637_p1 }
   0x9   :  { %p640_p4 = pnand %p639_p3, %p633_p0 }
   0xb   :  { %643 = shalt.err (!%p640_p4)
}
   0xc   :  { %s691_s12 = smov 1024   ;;  %s692_s13 = smov 64  }
   0xd   :  { %21 = dma.hbm_to_vmem [thread:$0]  %s733_s0, 32768, %s16_s10, [#allocation3], %s691_s12, %s691_s12, %s692_s13  }
   0xe   :  { %s693_s16 = smov [#allocation5]  }
   0xf   :  { %s28_s17 = sshll.u32 %s693_s16, 4  ;;  %s29_s17 = int_to_ptr.vmem [resolvable:$true] %s28_s17 }
  0x10   :  { %s652_s18 = scalar_lea.vmem %s29_s17, 128  ;;  %p657_p6 = scmp.lt.s32.totalorder %s29_s17, %s29_s17 }
  0x11   :  { %p653_p5 = scmp.ne.s32.totalorder %s29_s17, %s652_s18  ;;  %p658_p7 = scmp.lt.s32.totalorder %s652_s18, %s652_s18 }
  0x13   :  { %p659_p8 = por %p658_p7, %p657_p6 }
  0x15   :  { %p660_p9 = pnand %p659_p8, %p653_p5 }
  0x17   :  { %663 = shalt.err (!%p660_p9)
}
  0x18   :  { %31 = dma.hbm_to_vmem [thread:$0]  %s734_s1, 128, %s29_s17, [#allocation6]  }
  0x19   :  { %684 = dma.done.wait [#allocation3], 32768  }
  0x1a   :  { %685 = vsyncadd [#allocation3], 4294934528 }
  0x1b   :  { %686 = dma.done.wait [#allocation6], 128  }
  0x1c   :  { %687 = vsyncadd [#allocation6], 4294967168  ;;  %v160_v0 = vld [vmem:[#allocation2 + $0x3c8] sm:$0xff]  ;;  %v162_v1 = vld [vmem:[#allocation2 + $0x3d8] sm:$0xff]  ;;  %s694_s0 = smov [#allocation7]  }
  0x1d   :  { %v159_v2 = vld [vmem:[#allocation2 + $0x3c0] sm:$0xff]  ;;  %298 = vmatprep.subr.mxu0 %v160_v0  ;;  %369 = vmatprep.subr.mxu1 %v162_v1  ;;  %v161_v3 = vld [vmem:[#allocation2 + $0x3d0] sm:$0xff]  ;;  %v152_v4 = vld [vmem:[#allocation2 + $0x388] sm:$0xff]  ;;  %s608_s1 = sshll.u32 %s694_s0, 4  ;;  %s609_s1 = int_to_ptr.vmem [resolvable:$true] %s608_s1 }
  0x1e   :  { %v154_v5 = vld [vmem:[#allocation2 + $0x398] sm:$0xff]  ;;  %299 = vmatpush1.msra.mxu0 %v159_v2  ;;  %370 = vmatpush1.msra.mxu1 %v161_v3  ;;  %v151_v6 = vld [vmem:[#allocation2 + $0x380] sm:$0xff]  ;;  %v153_v7 = vld [vmem:[#allocation2 + $0x390] sm:$0xff]  ;;  %s664_s21 = scalar_lea.vmem %s609_s1, 512  ;;  %p669_p11 = scmp.lt.s32.totalorder %s609_s1, %s609_s1 }
  0x1f   :  { %v144_v8 = vld [vmem:[#allocation2 + $0x348] sm:$0xff]  ;;  %300 = vmatprep.subr.mxu0 %v152_v4  ;;  %371 = vmatprep.subr.mxu1 %v154_v5  ;;  %v146_v9 = vld [vmem:[#allocation2 + $0x358] sm:$0xff]  ;;  %v143_v10 = vld [vmem:[#allocation2 + $0x340] sm:$0xff]  ;;  %p665_p10 = scmp.ne.s32.totalorder %s609_s1, %s664_s21  ;;  %p670_p12 = scmp.lt.s32.totalorder %s664_s21, %s664_s21 }
  0x20   :  { %v145_v11 = vld [vmem:[#allocation2 + $0x350] sm:$0xff]  ;;  %301 = vmatpush1.msra.mxu0 %v151_v6  ;;  %372 = vmatpush1.msra.mxu1 %v153_v7  ;;  %v136_v12 = vld [vmem:[#allocation2 + $0x308] sm:$0xff]  ;;  %v138_v13 = vld [vmem:[#allocation2 + $0x318] sm:$0xff] }
  0x21   :  { %302 = vmatprep.subr.mxu0 %v144_v8  ;;  %373 = vmatprep.subr.mxu1 %v146_v9  ;;  %v135_v14 = vld [vmem:[#allocation2 + $0x300] sm:$0xff]  ;;  %v137_v15 = vld [vmem:[#allocation2 + $0x310] sm:$0xff]  ;;  %v128_v16 = vld [vmem:[#allocation2 + $0x2c8] sm:$0xff]  ;;  %p671_p13 = por %p670_p12, %p669_p11 }
  0x22   :  { %303 = vmatpush1.msra.mxu0 %v143_v10  ;;  %374 = vmatpush1.msra.mxu1 %v145_v11  ;;  %v130_v17 = vld [vmem:[#allocation2 + $0x2d8] sm:$0xff]  ;;  %v127_v18 = vld [vmem:[#allocation2 + $0x2c0] sm:$0xff]  ;;  %v129_v19 = vld [vmem:[#allocation2 + $0x2d0] sm:$0xff] }
  0x23   :  { %304 = vmatprep.subr.mxu0 %v136_v12  ;;  %375 = vmatprep.subr.mxu1 %v138_v13  ;;  %v120_v20 = vld [vmem:[#allocation2 + $0x288] sm:$0xff]  ;;  %v122_v21 = vld [vmem:[#allocation2 + $0x298] sm:$0xff]  ;;  %v119_v22 = vld [vmem:[#allocation2 + $0x280] sm:$0xff]  ;;  %p672_p0 = pnand %p671_p13, %p665_p10 }
  0x24   :  { %305 = vmatpush1.msra.mxu0 %v135_v14  ;;  %376 = vmatpush1.msra.mxu1 %v137_v15  ;;  %v121_v23 = vld [vmem:[#allocation2 + $0x290] sm:$0xff]  ;;  %v112_v24 = vld [vmem:[#allocation2 + $0x248] sm:$0xff]  ;;  %v114_v25 = vld [vmem:[#allocation2 + $0x258] sm:$0xff] }
  0x25   :  { %306 = vmatprep.subr.mxu0 %v128_v16  ;;  %377 = vmatprep.subr.mxu1 %v130_v17  ;;  %v111_v26 = vld [vmem:[#allocation2 + $0x240] sm:$0xff]  ;;  %v113_v27 = vld [vmem:[#allocation2 + $0x250] sm:$0xff]  ;;  %v104_v28 = vld [vmem:[#allocation2 + $0x208] sm:$0xff] }
  0x26   :  { %307 = vmatpush1.msra.mxu0 %v127_v18  ;;  %378 = vmatpush1.msra.mxu1 %v129_v19  ;;  %v106_v29 = vld [vmem:[#allocation2 + $0x218] sm:$0xff]  ;;  %v103_v30 = vld [vmem:[#allocation2 + $0x200] sm:$0xff]  ;;  %v105_v31 = vld [vmem:[#allocation2 + $0x210] sm:$0xff] }
  0x27   :  { %308 = vmatprep.subr.mxu0 %v120_v20  ;;  %379 = vmatprep.subr.mxu1 %v122_v21  ;;  %v96_v32 = vld [vmem:[#allocation2 + $0x1c8] sm:$0xff]  ;;  %v98_v33 = vld [vmem:[#allocation2 + $0x1d8] sm:$0xff]  ;;  %v95_v34 = vld [vmem:[#allocation2 + $0x1c0] sm:$0xff] }
  0x28   :  { %309 = vmatpush1.msra.mxu0 %v119_v22  ;;  %380 = vmatpush1.msra.mxu1 %v121_v23  ;;  %v97_v35 = vld [vmem:[#allocation2 + $0x1d0] sm:$0xff]  ;;  %v88_v36 = vld [vmem:[#allocation2 + $0x188] sm:$0xff]  ;;  %v90_v37 = vld [vmem:[#allocation2 + $0x198] sm:$0xff] }
  0x29   :  { %310 = vmatprep.subr.mxu0 %v112_v24  ;;  %381 = vmatprep.subr.mxu1 %v114_v25  ;;  %v87_v38 = vld [vmem:[#allocation2 + $0x180] sm:$0xff]  ;;  %v89_v39 = vld [vmem:[#allocation2 + $0x190] sm:$0xff]  ;;  %v80_v40 = vld [vmem:[#allocation2 + $0x148] sm:$0xff] }
  0x2a   :  { %311 = vmatpush1.msra.mxu0 %v111_v26  ;;  %382 = vmatpush1.msra.mxu1 %v113_v27  ;;  %v82_v41 = vld [vmem:[#allocation2 + $0x158] sm:$0xff]  ;;  %v79_v42 = vld [vmem:[#allocation2 + $0x140] sm:$0xff]  ;;  %v81_v43 = vld [vmem:[#allocation2 + $0x150] sm:$0xff] }
  0x2b   :  { %312 = vmatprep.subr.mxu0 %v104_v28  ;;  %383 = vmatprep.subr.mxu1 %v106_v29  ;;  %v72_v44 = vld [vmem:[#allocation2 + $0x108] sm:$0xff]  ;;  %v74_v45 = vld [vmem:[#allocation2 + $0x118] sm:$0xff]  ;;  %v71_v46 = vld [vmem:[#allocation2 + $0x100] sm:$0xff] }
  0x2c   :  { %313 = vmatpush1.msra.mxu0 %v103_v30  ;;  %384 = vmatpush1.msra.mxu1 %v105_v31  ;;  %v73_v47 = vld [vmem:[#allocation2 + $0x110] sm:$0xff]  ;;  %v64_v48 = vld [vmem:[#allocation2 + $0xc8] sm:$0xff]  ;;  %v66_v49 = vld [vmem:[#allocation2 + $0xd8] sm:$0xff] }
  0x2d   :  { %314 = vmatprep.subr.mxu0 %v96_v32  ;;  %385 = vmatprep.subr.mxu1 %v98_v33  ;;  %v63_v50 = vld [vmem:[#allocation2 + $0xc0] sm:$0xff]  ;;  %v65_v51 = vld [vmem:[#allocation2 + $0xd0] sm:$0xff]  ;;  %v56_v52 = vld [vmem:[#allocation2 + $0x88] sm:$0xff] }
  0x2e   :  { %315 = vmatpush1.msra.mxu0 %v95_v34  ;;  %386 = vmatpush1.msra.mxu1 %v97_v35  ;;  %v58_v53 = vld [vmem:[#allocation2 + $0x98] sm:$0xff]  ;;  %v55_v54 = vld [vmem:[#allocation2 + $0x80] sm:$0xff]  ;;  %v57_v55 = vld [vmem:[#allocation2 + $0x90] sm:$0xff] }
  0x2f   :  { %316 = vmatprep.subr.mxu0 %v88_v36  ;;  %387 = vmatprep.subr.mxu1 %v90_v37  ;;  %v48_v56 = vld [vmem:[#allocation2 + $0x48] sm:$0xff]  ;;  %v50_v57 = vld [vmem:[#allocation2 + $0x58] sm:$0xff]  ;;  %v47_v58 = vld [vmem:[#allocation2 + $0x40] sm:$0xff] }
  0x30   :  { %317 = vmatpush1.msra.mxu0 %v87_v38  ;;  %388 = vmatpush1.msra.mxu1 %v89_v39  ;;  %v49_v59 = vld [vmem:[#allocation2 + $0x50] sm:$0xff]  ;;  %v40_v60 = vld [vmem:[#allocation2 + $0x8] sm:$0xff]  ;;  %v42_v61 = vld [vmem:[#allocation2 + $0x18] sm:$0xff] }
  0x31   :  { %318 = vmatprep.subr.mxu0 %v80_v40  ;;  %389 = vmatprep.subr.mxu1 %v82_v41  ;;  %v39_v62 = vld [vmem:[#allocation2] sm:$0xff]  ;;  %v41_v63 = vld [vmem:[#allocation2 + $0x10] sm:$0xff]  ;;  %v288_v0 = vld [vmem:[#allocation2 + $0x7c8] sm:$0xff] }
  0x32   :  { %319 = vmatpush1.msra.mxu0 %v79_v42  ;;  %390 = vmatpush1.msra.mxu1 %v81_v43  ;;  %v290_v1 = vld [vmem:[#allocation2 + $0x7d8] sm:$0xff]  ;;  %v287_v2 = vld [vmem:[#allocation2 + $0x7c0] sm:$0xff]  ;;  %v289_v3 = vld [vmem:[#allocation2 + $0x7d0] sm:$0xff] }
  0x33   :  { %320 = vmatprep.subr.mxu0 %v72_v44  ;;  %391 = vmatprep.subr.mxu1 %v74_v45  ;;  %v280_v4 = vld [vmem:[#allocation2 + $0x788] sm:$0xff]  ;;  %v282_v5 = vld [vmem:[#allocation2 + $0x798] sm:$0xff]  ;;  %v279_v6 = vld [vmem:[#allocation2 + $0x780] sm:$0xff] }
  0x34   :  { %321 = vmatpush1.msra.mxu0 %v71_v46  ;;  %392 = vmatpush1.msra.mxu1 %v73_v47  ;;  %v281_v7 = vld [vmem:[#allocation2 + $0x790] sm:$0xff]  ;;  %v272_v8 = vld [vmem:[#allocation2 + $0x748] sm:$0xff]  ;;  %v274_v9 = vld [vmem:[#allocation2 + $0x758] sm:$0xff] }
  0x35   :  { %322 = vmatprep.subr.mxu0 %v64_v48  ;;  %393 = vmatprep.subr.mxu1 %v66_v49  ;;  %v271_v10 = vld [vmem:[#allocation2 + $0x740] sm:$0xff]  ;;  %v273_v11 = vld [vmem:[#allocation2 + $0x750] sm:$0xff]  ;;  %v264_v12 = vld [vmem:[#allocation2 + $0x708] sm:$0xff] }
  0x36   :  { %323 = vmatpush1.msra.mxu0 %v63_v50  ;;  %394 = vmatpush1.msra.mxu1 %v65_v51  ;;  %v266_v13 = vld [vmem:[#allocation2 + $0x718] sm:$0xff]  ;;  %v263_v14 = vld [vmem:[#allocation2 + $0x700] sm:$0xff]  ;;  %v265_v15 = vld [vmem:[#allocation2 + $0x710] sm:$0xff] }
  0x37   :  { %324 = vmatprep.subr.mxu0 %v56_v52  ;;  %395 = vmatprep.subr.mxu1 %v58_v53  ;;  %v256_v16 = vld [vmem:[#allocation2 + $0x6c8] sm:$0xff]  ;;  %v258_v17 = vld [vmem:[#allocation2 + $0x6d8] sm:$0xff]  ;;  %v255_v18 = vld [vmem:[#allocation2 + $0x6c0] sm:$0xff] }
  0x38   :  { %325 = vmatpush1.msra.mxu0 %v55_v54  ;;  %396 = vmatpush1.msra.mxu1 %v57_v55  ;;  %v257_v19 = vld [vmem:[#allocation2 + $0x6d0] sm:$0xff]  ;;  %v248_v20 = vld [vmem:[#allocation2 + $0x688] sm:$0xff]  ;;  %v250_v21 = vld [vmem:[#allocation2 + $0x698] sm:$0xff] }
  0x39   :  { %326 = vmatprep.subr.mxu0 %v48_v56  ;;  %397 = vmatprep.subr.mxu1 %v50_v57  ;;  %v247_v22 = vld [vmem:[#allocation2 + $0x680] sm:$0xff]  ;;  %v249_v23 = vld [vmem:[#allocation2 + $0x690] sm:$0xff]  ;;  %v240_v24 = vld [vmem:[#allocation2 + $0x648] sm:$0xff] }
  0x3a   :  { %327 = vmatpush1.msra.mxu0 %v47_v58  ;;  %398 = vmatpush1.msra.mxu1 %v49_v59  ;;  %v242_v25 = vld [vmem:[#allocation2 + $0x658] sm:$0xff]  ;;  %v239_v26 = vld [vmem:[#allocation2 + $0x640] sm:$0xff]  ;;  %v241_v27 = vld [vmem:[#allocation2 + $0x650] sm:$0xff] }
  0x3b   :  { %328 = vmatprep.subr.mxu0 %v40_v60  ;;  %399 = vmatprep.subr.mxu1 %v42_v61  ;;  %v232_v28 = vld [vmem:[#allocation2 + $0x608] sm:$0xff]  ;;  %v234_v29 = vld [vmem:[#allocation2 + $0x618] sm:$0xff]  ;;  %v231_v30 = vld [vmem:[#allocation2 + $0x600] sm:$0xff] }
  0x3c   :  { %329 = vmatpush1.msra.mxu0 %v39_v62  ;;  %400 = vmatpush1.msra.mxu1 %v41_v63  ;;  %v233_v31 = vld [vmem:[#allocation2 + $0x610] sm:$0xff]  ;;  %v224_v32 = vld [vmem:[#allocation2 + $0x5c8] sm:$0xff]  ;;  %v226_v33 = vld [vmem:[#allocation2 + $0x5d8] sm:$0xff] }
  0x3d   :  { %330 = vmatprep.subr.mxu0 %v288_v0  ;;  %401 = vmatprep.subr.mxu1 %v290_v1  ;;  %v223_v34 = vld [vmem:[#allocation2 + $0x5c0] sm:$0xff]  ;;  %v225_v35 = vld [vmem:[#allocation2 + $0x5d0] sm:$0xff]  ;;  %v216_v36 = vld [vmem:[#allocation2 + $0x588] sm:$0xff] }
  0x3e   :  { %331 = vmatpush2.msra.mxu0 %v287_v2  ;;  %402 = vmatpush2.msra.mxu1 %v289_v3  ;;  %v218_v37 = vld [vmem:[#allocation2 + $0x598] sm:$0xff]  ;;  %v215_v38 = vld [vmem:[#allocation2 + $0x580] sm:$0xff]  ;;  %v217_v39 = vld [vmem:[#allocation2 + $0x590] sm:$0xff] }
  0x3f   :  { %332 = vmatprep.subr.mxu0 %v280_v4  ;;  %403 = vmatprep.subr.mxu1 %v282_v5  ;;  %v208_v40 = vld [vmem:[#allocation2 + $0x548] sm:$0xff]  ;;  %v210_v41 = vld [vmem:[#allocation2 + $0x558] sm:$0xff]  ;;  %v207_v42 = vld [vmem:[#allocation2 + $0x540] sm:$0xff] }
  0x40   :  { %333 = vmatpush2.msra.mxu0 %v279_v6  ;;  %404 = vmatpush2.msra.mxu1 %v281_v7  ;;  %v209_v43 = vld [vmem:[#allocation2 + $0x550] sm:$0xff]  ;;  %v200_v44 = vld [vmem:[#allocation2 + $0x508] sm:$0xff]  ;;  %v202_v45 = vld [vmem:[#allocation2 + $0x518] sm:$0xff] }
  0x41   :  { %334 = vmatprep.subr.mxu0 %v272_v8  ;;  %405 = vmatprep.subr.mxu1 %v274_v9  ;;  %v199_v46 = vld [vmem:[#allocation2 + $0x500] sm:$0xff]  ;;  %v201_v47 = vld [vmem:[#allocation2 + $0x510] sm:$0xff]  ;;  %v192_v48 = vld [vmem:[#allocation2 + $0x4c8] sm:$0xff] }
  0x42   :  { %335 = vmatpush2.msra.mxu0 %v271_v10  ;;  %406 = vmatpush2.msra.mxu1 %v273_v11  ;;  %v194_v49 = vld [vmem:[#allocation2 + $0x4d8] sm:$0xff]  ;;  %v191_v50 = vld [vmem:[#allocation2 + $0x4c0] sm:$0xff]  ;;  %v193_v51 = vld [vmem:[#allocation2 + $0x4d0] sm:$0xff] }
  0x43   :  { %336 = vmatprep.subr.mxu0 %v264_v12  ;;  %407 = vmatprep.subr.mxu1 %v266_v13  ;;  %v184_v52 = vld [vmem:[#allocation2 + $0x488] sm:$0xff]  ;;  %v186_v53 = vld [vmem:[#allocation2 + $0x498] sm:$0xff]  ;;  %v183_v54 = vld [vmem:[#allocation2 + $0x480] sm:$0xff] }
  0x44   :  { %337 = vmatpush2.msra.mxu0 %v263_v14  ;;  %408 = vmatpush2.msra.mxu1 %v265_v15  ;;  %v185_v55 = vld [vmem:[#allocation2 + $0x490] sm:$0xff]  ;;  %v716_v56 = vld [vmem:[#allocation5] sm:$0xff]  ;;  %v176_v57 = vld [vmem:[#allocation2 + $0x448] sm:$0xff] }
  0x45   :  { %338 = vmatprep.subr.mxu0 %v256_v16  ;;  %409 = vmatprep.subr.mxu1 %v258_v17  ;;  %v178_v58 = vld [vmem:[#allocation2 + $0x458] sm:$0xff]  ;;  %v175_v59 = vld [vmem:[#allocation2 + $0x440] sm:$0xff]  ;;  %v177_v60 = vld [vmem:[#allocation2 + $0x450] sm:$0xff]  ;;  %v720_v63 = vcombine.high %v716_v56, %v716_v56 }
  0x46   :  { %339 = vmatpush2.msra.mxu0 %v255_v18  ;;  %410 = vmatpush2.msra.mxu1 %v257_v19  ;;  %v168_v61 = vld [vmem:[#allocation2 + $0x408] sm:$0xff]  ;;  %v170_v62 = vld [vmem:[#allocation2 + $0x418] sm:$0xff]  ;;  %v167_v0 = vld [vmem:[#allocation2 + $0x400] sm:$0xff] }
  0x47   :  { %340 = vmatprep.subr.mxu0 %v248_v20  ;;  %411 = vmatprep.subr.mxu1 %v250_v21  ;;  %v169_v1 = vld [vmem:[#allocation2 + $0x410] sm:$0xff]  ;;  %v164_v2 = vld [vmem:[#allocation2 + $0x3e8] sm:$0xff]  ;;  %v166_v3 = vld [vmem:[#allocation2 + $0x3f8] sm:$0xff] }
  0x48   :  { %341 = vmatpush2.msra.mxu0 %v247_v22  ;;  %412 = vmatpush2.msra.mxu1 %v249_v23  ;;  %v163_v4 = vld [vmem:[#allocation2 + $0x3e0] sm:$0xff]  ;;  %v165_v5 = vld [vmem:[#allocation2 + $0x3f0] sm:$0xff]  ;;  %v156_v6 = vld [vmem:[#allocation2 + $0x3a8] sm:$0xff] }
  0x49   :  { %342 = vmatprep.subr.mxu0 %v240_v24  ;;  %413 = vmatprep.subr.mxu1 %v242_v25  ;;  %v158_v7 = vld [vmem:[#allocation2 + $0x3b8] sm:$0xff]  ;;  %v155_v8 = vld [vmem:[#allocation2 + $0x3a0] sm:$0xff]  ;;  %v157_v9 = vld [vmem:[#allocation2 + $0x3b0] sm:$0xff] }
  0x4a   :  { %343 = vmatpush2.msra.mxu0 %v239_v26  ;;  %414 = vmatpush2.msra.mxu1 %v241_v27  ;;  %v148_v10 = vld [vmem:[#allocation2 + $0x368] sm:$0xff]  ;;  %v150_v11 = vld [vmem:[#allocation2 + $0x378] sm:$0xff]  ;;  %v147_v12 = vld [vmem:[#allocation2 + $0x360] sm:$0xff] }
  0x4b   :  { %344 = vmatprep.subr.mxu0 %v232_v28  ;;  %415 = vmatprep.subr.mxu1 %v234_v29  ;;  %v149_v13 = vld [vmem:[#allocation2 + $0x370] sm:$0xff]  ;;  %v140_v14 = vld [vmem:[#allocation2 + $0x328] sm:$0xff]  ;;  %v142_v15 = vld [vmem:[#allocation2 + $0x338] sm:$0xff] }
  0x4c   :  { %345 = vmatpush2.msra.mxu0 %v231_v30  ;;  %416 = vmatpush2.msra.mxu1 %v233_v31  ;;  %v139_v16 = vld [vmem:[#allocation2 + $0x320] sm:$0xff]  ;;  %v141_v17 = vld [vmem:[#allocation2 + $0x330] sm:$0xff]  ;;  %v132_v18 = vld [vmem:[#allocation2 + $0x2e8] sm:$0xff] }
  0x4d   :  { %346 = vmatprep.subr.mxu0 %v224_v32  ;;  %417 = vmatprep.subr.mxu1 %v226_v33  ;;  %v134_v19 = vld [vmem:[#allocation2 + $0x2f8] sm:$0xff]  ;;  %v131_v20 = vld [vmem:[#allocation2 + $0x2e0] sm:$0xff]  ;;  %v133_v21 = vld [vmem:[#allocation2 + $0x2f0] sm:$0xff] }
  0x4e   :  { %347 = vmatpush2.msra.mxu0 %v223_v34  ;;  %418 = vmatpush2.msra.mxu1 %v225_v35  ;;  %v124_v22 = vld [vmem:[#allocation2 + $0x2a8] sm:$0xff]  ;;  %v126_v23 = vld [vmem:[#allocation2 + $0x2b8] sm:$0xff]  ;;  %v123_v24 = vld [vmem:[#allocation2 + $0x2a0] sm:$0xff] }
  0x4f   :  { %348 = vmatprep.subr.mxu0 %v216_v36  ;;  %419 = vmatprep.subr.mxu1 %v218_v37  ;;  %v125_v25 = vld [vmem:[#allocation2 + $0x2b0] sm:$0xff]  ;;  %v116_v26 = vld [vmem:[#allocation2 + $0x268] sm:$0xff]  ;;  %v118_v27 = vld [vmem:[#allocation2 + $0x278] sm:$0xff] }
  0x50   :  { %349 = vmatpush2.msra.mxu0 %v215_v38  ;;  %420 = vmatpush2.msra.mxu1 %v217_v39  ;;  %v115_v28 = vld [vmem:[#allocation2 + $0x260] sm:$0xff]  ;;  %v117_v29 = vld [vmem:[#allocation2 + $0x270] sm:$0xff]  ;;  %v108_v30 = vld [vmem:[#allocation2 + $0x228] sm:$0xff] }
  0x51   :  { %350 = vmatprep.subr.mxu0 %v208_v40  ;;  %421 = vmatprep.subr.mxu1 %v210_v41  ;;  %v110_v31 = vld [vmem:[#allocation2 + $0x238] sm:$0xff]  ;;  %v107_v32 = vld [vmem:[#allocation2 + $0x220] sm:$0xff]  ;;  %v109_v33 = vld [vmem:[#allocation2 + $0x230] sm:$0xff] }
  0x52   :  { %351 = vmatpush2.msra.mxu0 %v207_v42  ;;  %422 = vmatpush2.msra.mxu1 %v209_v43  ;;  %v100_v34 = vld [vmem:[#allocation2 + $0x1e8] sm:$0xff]  ;;  %v102_v35 = vld [vmem:[#allocation2 + $0x1f8] sm:$0xff]  ;;  %v99_v36 = vld [vmem:[#allocation2 + $0x1e0] sm:$0xff] }
  0x53   :  { %352 = vmatprep.subr.mxu0 %v200_v44  ;;  %423 = vmatprep.subr.mxu1 %v202_v45  ;;  %v101_v37 = vld [vmem:[#allocation2 + $0x1f0] sm:$0xff]  ;;  %v92_v38 = vld [vmem:[#allocation2 + $0x1a8] sm:$0xff]  ;;  %v94_v39 = vld [vmem:[#allocation2 + $0x1b8] sm:$0xff] }
  0x54   :  { %353 = vmatpush2.msra.mxu0 %v199_v46  ;;  %424 = vmatpush2.msra.mxu1 %v201_v47  ;;  %v91_v40 = vld [vmem:[#allocation2 + $0x1a0] sm:$0xff]  ;;  %v93_v41 = vld [vmem:[#allocation2 + $0x1b0] sm:$0xff]  ;;  %v84_v42 = vld [vmem:[#allocation2 + $0x168] sm:$0xff] }
  0x55   :  { %354 = vmatprep.subr.mxu0 %v192_v48  ;;  %425 = vmatprep.subr.mxu1 %v194_v49  ;;  %v86_v43 = vld [vmem:[#allocation2 + $0x178] sm:$0xff]  ;;  %v83_v44 = vld [vmem:[#allocation2 + $0x160] sm:$0xff]  ;;  %v85_v45 = vld [vmem:[#allocation2 + $0x170] sm:$0xff] }
  0x56   :  { %355 = vmatpush2.msra.mxu0 %v191_v50  ;;  %426 = vmatpush2.msra.mxu1 %v193_v51  ;;  %v76_v46 = vld [vmem:[#allocation2 + $0x128] sm:$0xff]  ;;  %v78_v47 = vld [vmem:[#allocation2 + $0x138] sm:$0xff]  ;;  %v75_v48 = vld [vmem:[#allocation2 + $0x120] sm:$0xff] }
  0x57   :  { %356 = vmatprep.subr.mxu0 %v184_v52  ;;  %427 = vmatprep.subr.mxu1 %v186_v53  ;;  %v77_v49 = vld [vmem:[#allocation2 + $0x130] sm:$0xff]  ;;  %v68_v50 = vld [vmem:[#allocation2 + $0xe8] sm:$0xff]  ;;  %v70_v51 = vld [vmem:[#allocation2 + $0xf8] sm:$0xff] }
  0x58   :  { %357 = vmatpush2.msra.mxu0 %v183_v54  ;;  %428 = vmatpush2.msra.mxu1 %v185_v55  ;;  %v67_v52 = vld [vmem:[#allocation2 + $0xe0] sm:$0xff]  ;;  %v69_v53 = vld [vmem:[#allocation2 + $0xf0] sm:$0xff]  ;;  %v60_v54 = vld [vmem:[#allocation2 + $0xa8] sm:$0xff] }
  0x59   :  { %358 = vmatprep.subr.mxu0 %v176_v57  ;;  %429 = vmatprep.subr.mxu1 %v178_v58  ;;  %v62_v55 = vld [vmem:[#allocation2 + $0xb8] sm:$0xff]  ;;  %v59_v57 = vld [vmem:[#allocation2 + $0xa0] sm:$0xff]  ;;  %v61_v58 = vld [vmem:[#allocation2 + $0xb0] sm:$0xff] }
  0x5a   :  { %359 = vmatpush2.msra.mxu0 %v175_v59  ;;  %430 = vmatpush2.msra.mxu1 %v177_v60  ;;  %v52_v59 = vld [vmem:[#allocation2 + $0x68] sm:$0xff]  ;;  %v54_v60 = vld [vmem:[#allocation2 + $0x78] sm:$0xff] }
  0x5b   :  { %360 = vmatprep.subr.mxu0 %v168_v61  ;;  %431 = vmatprep.subr.mxu1 %v170_v62  ;;  %v51_v61 = vld [vmem:[#allocation2 + $0x60] sm:$0xff]  ;;  %v53_v62 = vld [vmem:[#allocation2 + $0x70] sm:$0xff] }
  0x5c   :  { %361 = vmatpush2.msra.mxu0 %v167_v0  ;;  %362 = vmatprep.mubr.f32.mxu0 %v720_v63  ;;  %v44_v0 = vld [vmem:[#allocation2 + $0x28] sm:$0xff] }
  0x5d   :  { %432 = vmatpush2.msra.mxu1 %v169_v1  ;;  %433 = vmatprep.mubr.f32.mxu1 %v720_v63  ;;  %v46_v1 = vld [vmem:[#allocation2 + $0x38] sm:$0xff] }
  0x5e   :  { %363 = vmatmul.mubr.f32.vlgmr.msra.gmra.mxu0 %v716_v56  ;;  %434 = vmatmul.mubr.f32.vlgmr.msra.gmra.mxu1 %v716_v56 }
  0x5f   :  { %440 = vmatprep.subr.mxu0 %v164_v2  ;;  %511 = vmatprep.subr.mxu1 %v166_v3  ;;  %v43_v2 = vld [vmem:[#allocation2 + $0x20] sm:$0xff]  ;;  %v45_v3 = vld [vmem:[#allocation2 + $0x30] sm:$0xff] }
  0x60   :  { %441 = vmatpush1.msra.mxu0 %v163_v4  ;;  %512 = vmatpush1.msra.mxu1 %v165_v5  ;;  %v292_v4 = vld [vmem:[#allocation2 + $0x7e8] sm:$0xff]  ;;  %v294_v5 = vld [vmem:[#allocation2 + $0x7f8] sm:$0xff] }
  0x61   :  { %442 = vmatprep.subr.mxu0 %v156_v6  ;;  %513 = vmatprep.subr.mxu1 %v158_v7  ;;  %v291_v6 = vld [vmem:[#allocation2 + $0x7e0] sm:$0xff]  ;;  %v293_v7 = vld [vmem:[#allocation2 + $0x7f0] sm:$0xff] }
  0x62   :  { %443 = vmatpush1.msra.mxu0 %v155_v8  ;;  %514 = vmatpush1.msra.mxu1 %v157_v9  ;;  %v284_v8 = vld [vmem:[#allocation2 + $0x7a8] sm:$0xff]  ;;  %v286_v9 = vld [vmem:[#allocation2 + $0x7b8] sm:$0xff] }
  0x63   :  { %444 = vmatprep.subr.mxu0 %v148_v10  ;;  %515 = vmatprep.subr.mxu1 %v150_v11  ;;  %v283_v10 = vld [vmem:[#allocation2 + $0x7a0] sm:$0xff]  ;;  %v285_v11 = vld [vmem:[#allocation2 + $0x7b0] sm:$0xff] }
  0x64   :  { %445 = vmatpush1.msra.mxu0 %v147_v12  ;;  %516 = vmatpush1.msra.mxu1 %v149_v13  ;;  %v276_v12 = vld [vmem:[#allocation2 + $0x768] sm:$0xff]  ;;  %v278_v13 = vld [vmem:[#allocation2 + $0x778] sm:$0xff] }
  0x65   :  { %446 = vmatprep.subr.mxu0 %v140_v14  ;;  %517 = vmatprep.subr.mxu1 %v142_v15  ;;  %v275_v14 = vld [vmem:[#allocation2 + $0x760] sm:$0xff]  ;;  %v277_v15 = vld [vmem:[#allocation2 + $0x770] sm:$0xff] }
  0x66   :  { %447 = vmatpush1.msra.mxu0 %v139_v16  ;;  %518 = vmatpush1.msra.mxu1 %v141_v17  ;;  %v268_v16 = vld [vmem:[#allocation2 + $0x728] sm:$0xff]  ;;  %v270_v17 = vld [vmem:[#allocation2 + $0x738] sm:$0xff] }
  0x67   :  { %448 = vmatprep.subr.mxu0 %v132_v18  ;;  %519 = vmatprep.subr.mxu1 %v134_v19  ;;  %v267_v18 = vld [vmem:[#allocation2 + $0x720] sm:$0xff]  ;;  %v269_v19 = vld [vmem:[#allocation2 + $0x730] sm:$0xff] }
  0x68   :  { %449 = vmatpush1.msra.mxu0 %v131_v20  ;;  %520 = vmatpush1.msra.mxu1 %v133_v21  ;;  %v260_v20 = vld [vmem:[#allocation2 + $0x6e8] sm:$0xff]  ;;  %v262_v21 = vld [vmem:[#allocation2 + $0x6f8] sm:$0xff] }
  0x69   :  { %450 = vmatprep.subr.mxu0 %v124_v22  ;;  %521 = vmatprep.subr.mxu1 %v126_v23  ;;  %v259_v22 = vld [vmem:[#allocation2 + $0x6e0] sm:$0xff]  ;;  %v261_v23 = vld [vmem:[#allocation2 + $0x6f0] sm:$0xff] }
  0x6a   :  { %451 = vmatpush1.msra.mxu0 %v123_v24  ;;  %522 = vmatpush1.msra.mxu1 %v125_v25  ;;  %v252_v24 = vld [vmem:[#allocation2 + $0x6a8] sm:$0xff]  ;;  %v254_v25 = vld [vmem:[#allocation2 + $0x6b8] sm:$0xff] }
  0x6b   :  { %452 = vmatprep.subr.mxu0 %v116_v26  ;;  %523 = vmatprep.subr.mxu1 %v118_v27  ;;  %v251_v26 = vld [vmem:[#allocation2 + $0x6a0] sm:$0xff]  ;;  %v253_v27 = vld [vmem:[#allocation2 + $0x6b0] sm:$0xff] }
  0x6c   :  { %453 = vmatpush1.msra.mxu0 %v115_v28  ;;  %524 = vmatpush1.msra.mxu1 %v117_v29  ;;  %v244_v28 = vld [vmem:[#allocation2 + $0x668] sm:$0xff]  ;;  %v246_v29 = vld [vmem:[#allocation2 + $0x678] sm:$0xff] }
  0x6d   :  { %454 = vmatprep.subr.mxu0 %v108_v30  ;;  %525 = vmatprep.subr.mxu1 %v110_v31  ;;  %v243_v30 = vld [vmem:[#allocation2 + $0x660] sm:$0xff]  ;;  %v245_v31 = vld [vmem:[#allocation2 + $0x670] sm:$0xff] }
  0x6e   :  { %455 = vmatpush1.msra.mxu0 %v107_v32  ;;  %526 = vmatpush1.msra.mxu1 %v109_v33  ;;  %v236_v32 = vld [vmem:[#allocation2 + $0x628] sm:$0xff]  ;;  %v238_v33 = vld [vmem:[#allocation2 + $0x638] sm:$0xff] }
  0x6f   :  { %456 = vmatprep.subr.mxu0 %v100_v34  ;;  %527 = vmatprep.subr.mxu1 %v102_v35  ;;  %v235_v34 = vld [vmem:[#allocation2 + $0x620] sm:$0xff]  ;;  %v237_v35 = vld [vmem:[#allocation2 + $0x630] sm:$0xff] }
  0x70   :  { %457 = vmatpush1.msra.mxu0 %v99_v36  ;;  %528 = vmatpush1.msra.mxu1 %v101_v37  ;;  %v228_v36 = vld [vmem:[#allocation2 + $0x5e8] sm:$0xff]  ;;  %v230_v37 = vld [vmem:[#allocation2 + $0x5f8] sm:$0xff] }
  0x71   :  { %458 = vmatprep.subr.mxu0 %v92_v38  ;;  %529 = vmatprep.subr.mxu1 %v94_v39  ;;  %v227_v38 = vld [vmem:[#allocation2 + $0x5e0] sm:$0xff]  ;;  %v229_v39 = vld [vmem:[#allocation2 + $0x5f0] sm:$0xff] }
  0x72   :  { %459 = vmatpush1.msra.mxu0 %v91_v40  ;;  %530 = vmatpush1.msra.mxu1 %v93_v41  ;;  %v220_v40 = vld [vmem:[#allocation2 + $0x5a8] sm:$0xff]  ;;  %v222_v41 = vld [vmem:[#allocation2 + $0x5b8] sm:$0xff] }
  0x73   :  { %460 = vmatprep.subr.mxu0 %v84_v42  ;;  %531 = vmatprep.subr.mxu1 %v86_v43  ;;  %v219_v42 = vld [vmem:[#allocation2 + $0x5a0] sm:$0xff]  ;;  %v221_v43 = vld [vmem:[#allocation2 + $0x5b0] sm:$0xff] }
  0x74   :  { %461 = vmatpush1.msra.mxu0 %v83_v44  ;;  %532 = vmatpush1.msra.mxu1 %v85_v45  ;;  %v212_v44 = vld [vmem:[#allocation2 + $0x568] sm:$0xff]  ;;  %v214_v45 = vld [vmem:[#allocation2 + $0x578] sm:$0xff] }
  0x75   :  { %462 = vmatprep.subr.mxu0 %v76_v46  ;;  %533 = vmatprep.subr.mxu1 %v78_v47  ;;  %v211_v46 = vld [vmem:[#allocation2 + $0x560] sm:$0xff]  ;;  %v213_v47 = vld [vmem:[#allocation2 + $0x570] sm:$0xff] }
  0x76   :  { %463 = vmatpush1.msra.mxu0 %v75_v48  ;;  %534 = vmatpush1.msra.mxu1 %v77_v49  ;;  %v204_v48 = vld [vmem:[#allocation2 + $0x528] sm:$0xff]  ;;  %v206_v49 = vld [vmem:[#allocation2 + $0x538] sm:$0xff] }
  0x77   :  { %464 = vmatprep.subr.mxu0 %v68_v50  ;;  %535 = vmatprep.subr.mxu1 %v70_v51  ;;  %v203_v50 = vld [vmem:[#allocation2 + $0x520] sm:$0xff]  ;;  %v205_v51 = vld [vmem:[#allocation2 + $0x530] sm:$0xff] }
  0x78   :  { %465 = vmatpush1.msra.mxu0 %v67_v52  ;;  %536 = vmatpush1.msra.mxu1 %v69_v53  ;;  %v196_v52 = vld [vmem:[#allocation2 + $0x4e8] sm:$0xff]  ;;  %v198_v53 = vld [vmem:[#allocation2 + $0x4f8] sm:$0xff] }
  0x79   :  { %466 = vmatprep.subr.mxu0 %v60_v54  ;;  %537 = vmatprep.subr.mxu1 %v62_v55  ;;  %v195_v54 = vld [vmem:[#allocation2 + $0x4e0] sm:$0xff]  ;;  %v197_v55 = vld [vmem:[#allocation2 + $0x4f0] sm:$0xff] }
  0x7a   :  { %467 = vmatpush1.msra.mxu0 %v59_v57  ;;  %538 = vmatpush1.msra.mxu1 %v61_v58  ;;  %v188_v57 = vld [vmem:[#allocation2 + $0x4a8] sm:$0xff]  ;;  %v190_v58 = vld [vmem:[#allocation2 + $0x4b8] sm:$0xff] }
  0x7b   :  { %468 = vmatprep.subr.mxu0 %v52_v59  ;;  %539 = vmatprep.subr.mxu1 %v54_v60  ;;  %v187_v59 = vld [vmem:[#allocation2 + $0x4a0] sm:$0xff]  ;;  %v189_v60 = vld [vmem:[#allocation2 + $0x4b0] sm:$0xff] }
  0x7c   :  { %469 = vmatpush1.msra.mxu0 %v51_v61  ;;  %540 = vmatpush1.msra.mxu1 %v53_v62  ;;  %v180_v61 = vld [vmem:[#allocation2 + $0x468] sm:$0xff]  ;;  %v182_v62 = vld [vmem:[#allocation2 + $0x478] sm:$0xff] }
  0x7d   :  { %470 = vmatprep.subr.mxu0 %v44_v0  ;;  %541 = vmatprep.subr.mxu1 %v46_v1  ;;  %v179_v0 = vld [vmem:[#allocation2 + $0x460] sm:$0xff]  ;;  %v181_v1 = vld [vmem:[#allocation2 + $0x470] sm:$0xff] }
  0x7e   :  { %471 = vmatpush1.msra.mxu0 %v43_v2  ;;  %542 = vmatpush1.msra.mxu1 %v45_v3  ;;  %v172_v2 = vld [vmem:[#allocation2 + $0x428] sm:$0xff]  ;;  %v174_v3 = vld [vmem:[#allocation2 + $0x438] sm:$0xff] }
  0x7f   :  { %472 = vmatprep.subr.mxu0 %v292_v4  ;;  %543 = vmatprep.subr.mxu1 %v294_v5  ;;  %v171_v4 = vld [vmem:[#allocation2 + $0x420] sm:$0xff]  ;;  %v173_v5 = vld [vmem:[#allocation2 + $0x430] sm:$0xff] }
  0x80   :  { %473 = vmatpush2.msra.mxu0 %v291_v6  ;;  %544 = vmatpush2.msra.mxu1 %v293_v7 }
  0x81   :  { %474 = vmatprep.subr.mxu0 %v284_v8  ;;  %545 = vmatprep.subr.mxu1 %v286_v9 }
  0x82   :  { %475 = vmatpush2.msra.mxu0 %v283_v10  ;;  %546 = vmatpush2.msra.mxu1 %v285_v11 }
  0x83   :  { %476 = vmatprep.subr.mxu0 %v276_v12  ;;  %547 = vmatprep.subr.mxu1 %v278_v13 }
  0x84   :  { %477 = vmatpush2.msra.mxu0 %v275_v14  ;;  %548 = vmatpush2.msra.mxu1 %v277_v15 }
  0x85   :  { %478 = vmatprep.subr.mxu0 %v268_v16  ;;  %549 = vmatprep.subr.mxu1 %v270_v17 }
  0x86   :  { %479 = vmatpush2.msra.mxu0 %v267_v18  ;;  %550 = vmatpush2.msra.mxu1 %v269_v19 }
  0x87   :  { %480 = vmatprep.subr.mxu0 %v260_v20  ;;  %551 = vmatprep.subr.mxu1 %v262_v21 }
  0x88   :  { %481 = vmatpush2.msra.mxu0 %v259_v22  ;;  %552 = vmatpush2.msra.mxu1 %v261_v23 }
  0x89   :  { %482 = vmatprep.subr.mxu0 %v252_v24  ;;  %553 = vmatprep.subr.mxu1 %v254_v25 }
  0x8a   :  { %483 = vmatpush2.msra.mxu0 %v251_v26  ;;  %554 = vmatpush2.msra.mxu1 %v253_v27 }
  0x8b   :  { %484 = vmatprep.subr.mxu0 %v244_v28  ;;  %555 = vmatprep.subr.mxu1 %v246_v29 }
  0x8c   :  { %485 = vmatpush2.msra.mxu0 %v243_v30  ;;  %556 = vmatpush2.msra.mxu1 %v245_v31 }
  0x8d   :  { %486 = vmatprep.subr.mxu0 %v236_v32  ;;  %557 = vmatprep.subr.mxu1 %v238_v33 }
  0x8e   :  { %487 = vmatpush2.msra.mxu0 %v235_v34  ;;  %558 = vmatpush2.msra.mxu1 %v237_v35 }
  0x8f   :  { %488 = vmatprep.subr.mxu0 %v228_v36  ;;  %559 = vmatprep.subr.mxu1 %v230_v37 }
  0x90   :  { %489 = vmatpush2.msra.mxu0 %v227_v38  ;;  %560 = vmatpush2.msra.mxu1 %v229_v39 }
  0x91   :  { %490 = vmatprep.subr.mxu0 %v220_v40  ;;  %561 = vmatprep.subr.mxu1 %v222_v41 }
  0x92   :  { %491 = vmatpush2.msra.mxu0 %v219_v42  ;;  %562 = vmatpush2.msra.mxu1 %v221_v43 }
  0x93   :  { %492 = vmatprep.subr.mxu0 %v212_v44  ;;  %563 = vmatprep.subr.mxu1 %v214_v45 }
  0x94   :  { %493 = vmatpush2.msra.mxu0 %v211_v46  ;;  %564 = vmatpush2.msra.mxu1 %v213_v47 }
  0x95   :  { %494 = vmatprep.subr.mxu0 %v204_v48  ;;  %565 = vmatprep.subr.mxu1 %v206_v49 }
  0x96   :  { %495 = vmatpush2.msra.mxu0 %v203_v50  ;;  %566 = vmatpush2.msra.mxu1 %v205_v51 }
  0x97   :  { %496 = vmatprep.subr.mxu0 %v196_v52  ;;  %567 = vmatprep.subr.mxu1 %v198_v53 }
  0x98   :  { %497 = vmatpush2.msra.mxu0 %v195_v54  ;;  %568 = vmatpush2.msra.mxu1 %v197_v55 }
  0x99   :  { %498 = vmatprep.subr.mxu0 %v188_v57  ;;  %569 = vmatprep.subr.mxu1 %v190_v58 }
  0x9a   :  { %499 = vmatpush2.msra.mxu0 %v187_v59  ;;  %570 = vmatpush2.msra.mxu1 %v189_v60 }
  0x9b   :  { %500 = vmatprep.subr.mxu0 %v180_v61  ;;  %571 = vmatprep.subr.mxu1 %v182_v62 }
  0x9c   :  { %501 = vmatpush2.msra.mxu0 %v179_v0  ;;  %572 = vmatpush2.msra.mxu1 %v181_v1 }
  0x9d   :  { %502 = vmatprep.subr.mxu0 %v172_v2  ;;  %573 = vmatprep.subr.mxu1 %v174_v3 }
  0x9e   :  { %503 = vmatpush2.msra.mxu0 %v171_v4  ;;  %504 = vmatprep.mubr.f32.mxu0 %v720_v63 }
  0x9f   :  { %574 = vmatpush2.msra.mxu1 %v173_v5  ;;  %575 = vmatprep.mubr.f32.mxu1 %v720_v63 }
  0xa0   :  { %505 = vmatmul.mubr.f32.vlgmr.msra.gmra.mxu0 %v716_v56  ;;  %576 = vmatmul.mubr.f32.vlgmr.msra.gmra.mxu1 %v716_v56 }
 0x11e   :  { %v364_v6 = vpop.f32.mrf.mxu0  ;;  %v435_v7 = vpop.f32.mrf.mxu1 }
 0x120   :  { %v366_v8 = vpop.f32.mrf.mxu0  ;;  %v437_v9 = vpop.f32.mrf.mxu1 }
 0x121   :  { %v590_v10 = vcombine.low %v364_v6, %v366_v8  ;;  %v591_v11 = vcombine.low %v435_v7, %v437_v9 }
 0x123   :  { %598 = vst [vmem:[#allocation7] sm:$0xff] %v590_v10  ;;  %599 = vst [vmem:[#allocation7 + $0x8] sm:$0xff] %v591_v11 }
 0x160   :  { %v506_v12 = vpop.f32.mrf.mxu0  ;;  %v577_v13 = vpop.f32.mrf.mxu1 }
 0x162   :  { %v508_v14 = vpop.f32.mrf.mxu0  ;;  %v579_v15 = vpop.f32.mrf.mxu1 }
 0x163   :  { %v592_v16 = vcombine.low %v506_v12, %v508_v14  ;;  %v593_v63 = vcombine.low %v577_v13, %v579_v15 }
 0x165   :  { %600 = vst [vmem:[#allocation7 + $0x10] sm:$0xff] %v592_v16  ;;  %601 = vst [vmem:[#allocation7 + $0x18] sm:$0xff] %v593_v63 }
 0x166   :  { %675 = shalt.err (!%p672_p0)
}
 0x167   :  { %611 = dma.vmem_to_hbm [thread:$0]  %s609_s1, 512, %s735_s2, [#allocation4]  }
 0x168   :  { %688 = dma.done.wait [#allocation4], 512  }
 0x169   :  { %689 = vsyncadd [#allocation4], 4294966784 }
 0x16a   :  { %615 = vsyncpa [#allocation3], 1 }
 0x16b   :  { %616 = vsyncpa [#allocation6], 1 }
 0x16c   :  { %617 = vsyncpa [#allocation4], 1 }

</bundles_post_ra>
